<compile_context>
chip_gen: v7x
topology: tpu7x:2x2x1
jax: 0.10.0
libtpu: 0.0.40
codegen_flags: <defaults>
</compile_context>

<pallas_src>
import functools

import jax
import jax.numpy as jnp
from jax import lax
from jax.experimental import pallas as pl
from jax.experimental.pallas import tpu as pltpu


# ----------------------------------------------------------------------------
# Small helpers
# ----------------------------------------------------------------------------
def _block_spec(shape, index_map, buffers=None):
    """BlockSpec with optional deeper multi-buffering (graceful fallback)."""
    if buffers is not None:
        try:
            return pl.BlockSpec(shape, index_map,
                                pipeline_mode=pl.Buffered(buffers))
        except Exception:
            pass
    return pl.BlockSpec(shape, index_map)


def _vmem_budget_bytes():
    """~75% of physical VMEM: ~96 MiB on v5e/v6e (128 MiB), ~48 MiB on v7x."""
    cap = 64 * 1024 * 1024
    try:
        info = pltpu.get_tpu_info()
        cap = int(getattr(info, "vmem_capacity_bytes", cap)) or cap
    except Exception:
        pass
    return (cap * 3) // 4


def _round_up(n, m):
    return ((n + m - 1) // m) * m


def _c_tile_candidates(C):
    """Channel tiles satisfying the (8,128) layout rule (mult of 8, or full C),
    descending."""
    cands = {C}
    if C % 8 == 0:
        cands.update(d for d in range(8, C + 1, 8) if C % d == 0)
    return sorted(cands, reverse=True)


def _pick_hw_tile(HWp, max_elems):
    """Largest divisor of HWp that is a multiple of 128 and <= max_elems."""
    k = HWp // 128
    best, d = 128, 1
    while d * 128 <= min(HWp, max_elems):
        if k % d == 0:
            best = d * 128
        d += 1
    return best


def _pick_b_tile(B, per_b_bytes, target_bytes):
    cap = max(1, target_bytes // max(per_b_bytes, 1))
    best = 1
    for d in range(1, B + 1):
        if d > cap:
            break
        if B % d == 0:
            best = d
    return best


def _streaming_tiles(B, C, HWp, itemsize, block_bytes=4 * 1024 * 1024):
    """Tile choice for the streaming (two-pass / eval) kernels: ~2-4 MiB,
    lane-dense blocks; >=2 channel blocks when the layout allows it."""
    c_cap = 128
    if C % 16 == 0:
        c_cap = min(c_cap, C // 2)          # guarantee >=2 channel blocks
    cands = _c_tile_candidates(C)
    valid = [c for c in cands if c <= c_cap]
    ct = valid[0] if valid else C
    hw_tile = _pick_hw_tile(HWp, max(128, block_bytes // max(ct * itemsize, 1)))
    b_tile = _pick_b_tile(B, ct * hw_tile * itemsize, block_bytes)
    return ct, b_tile, hw_tile


# ----------------------------------------------------------------------------
# Kernels
# ----------------------------------------------------------------------------
def _fused_train_kernel(x_ref, w_ref, b_ref, y_ref, mean_ref, var_ref, *,
                        inv_m, pad_count, eps, hw_chunk, n_chunks):
    """Fused BN over a VMEM-resident (B, c_tile, HWp) slab.

    Three in-kernel sweeps (VMEM only, no extra HBM traffic):
      A) per-channel mean, B) centered variance, C) normalize.
    Zero-padded HW columns are corrected analytically via `pad_count`.
    """
    unroll = n_chunks <= 8

    def sweep(body):
        def step(k, carry):
            off = pl.multiple_of(k * hw_chunk, 128)
            body(off)
            return carry
        lax.fori_loop(0, n_chunks, step, 0, unroll=unroll)

    # ---- Pass A: per-channel sum -> mean ----
    mean_ref[...] = jnp.zeros_like(mean_ref)

    def _sum(off):
        xs = x_ref[:, :, pl.ds(off, hw_chunk)].astype(jnp.float32)
        mean_ref[...] += jnp.sum(jnp.sum(xs, axis=0), axis=-1, keepdims=True)

    sweep(_sum)
    mean_ref[...] = mean_ref[...] * inv_m
    mean = mean_ref[...]                                   # (c_tile, 1)

    # ---- Pass B: centered sum of squares -> variance ----
    var_ref[...] = jnp.zeros_like(var_ref)

    def _var(off):
        xs = x_ref[:, :, pl.ds(off, hw_chunk)].astype(jnp.float32)
        d = xs - mean[None, :, :]
        var_ref[...] += jnp.sum(jnp.sum(d * d, axis=0), axis=-1, keepdims=True)

    sweep(_var)
    var = jnp.maximum((var_ref[...] - pad_count * mean * mean) * inv_m, 0.0)
    var_ref[...] = var

    # ---- Pass C: y = x * scale + shift (affine folded into whitening) ----
    scale = w_ref[...] / jnp.sqrt(var + eps)               # (c_tile, 1)
    shift = b_ref[...] - mean * scale

    def _norm(off):
        xs = x_ref[:, :, pl.ds(off, hw_chunk)].astype(jnp.float32)
        y_ref[:, :, pl.ds(off, hw_chunk)] = (
            xs * scale[None, :, :] + shift[None, :, :]).astype(y_ref.dtype)

    sweep(_norm)


def _stats_kernel(x_ref, pivot_ref, sum_ref, sq_ref, acc_s, acc_q):
    """Streaming stats: accumulate per-channel sum / sum-of-squares of
    d = x - pivot (pivot = running_mean, for numerical robustness).

    x_ref : (b_tile, c_tile, hw_tile);  sum_ref/sq_ref/acc_* : (c_tile, 1).
    """
    b = pl.program_id(1)
    hw = pl.program_id(2)

    @pl.when((b == 0) & (hw == 0))
    def _init():
        acc_s[...] = jnp.zeros_like(acc_s)
        acc_q[...] = jnp.zeros_like(acc_q)

    d = x_ref[...].astype(jnp.float32) - pivot_ref[...][None, :, :]
    acc_s[...] += jnp.sum(jnp.sum(d, axis=0), axis=-1, keepdims=True)
    acc_q[...] += jnp.sum(jnp.sum(d * d, axis=0), axis=-1, keepdims=True)

    @pl.when((b == pl.num_programs(1) - 1) & (hw == pl.num_programs(2) - 1))
    def _finalize():
        sum_ref[...] = acc_s[...]
        sq_ref[...] = acc_q[...]


def _norm_kernel(x_ref, scale_ref, shift_ref, y_ref):
    """y = x * scale + shift (per-channel, affine already folded)."""
    x = x_ref[...].astype(jnp.float32)                     # (b_t, c_t, hw_t)
    y_ref[...] = (x * scale_ref[...][None, :, :]
                  + shift_ref[...][None, :, :]).astype(y_ref.dtype)


# ----------------------------------------------------------------------------
# Wrapper
# ----------------------------------------------------------------------------
def mybn_forward(x, weight, bias, running_mean, running_var,
                 *, eps=1e-5, momentum=0.1, is_training=True,
                 force_two_pass=False):
    """x: (B, C, H, W).  Returns (y, batch_mean, batch_var,
    new_running_mean, new_running_var)."""
    B, C, H, W = x.shape
    HW = H * W
    HWp = _round_up(HW, 128)
    itemsize = x.dtype.itemsize

    x3 = x.reshape(B, C, HW)                   # free reshape (NCHW layout)
    if HWp != HW:
        # Lane-dense padding; zero columns are corrected analytically below.
        x3 = jnp.pad(x3, ((0, 0), (0, 0), (0, HWp - HW)))

    budget = _vmem_budget_bytes()

    rm = running_mean.astype(jnp.float32)
    rv = running_var.astype(jnp.float32)
    w = weight.astype(jnp.float32)
    bb = bias.astype(jnp.float32)

    m = float(B * HW)
    pad_count = float(B * (HWp - HW))

    y3p = None
    need_norm_pass = True

    if is_training:
        # ------------------ try the fused single-HBM-pass path --------------
        fused_c = None
        fused_chunk = 128
        if not force_two_pass:
            def _fits(ct):
                slab = B * ct * HWp * itemsize                 # one x / y buffer
                chunk_cap = max(
                    128, (2 * 1024 * 1024) // max(B * ct * 4, 1) // 128 * 128)
                hw_chunk = _pick_hw_tile(HWp, chunk_cap)
                temps = 4 * B * ct * hw_chunk * 4              # f32 chunk temporaries
                return (4 * slab + temps) <= int(budget * 0.9), hw_chunk

            cands = _c_tile_candidates(C)
            # Prefer the largest c_tile that fits AND gives >=2 channel blocks
            # (v7x megacore + DMA/compute overlap); otherwise largest that fits.
            for ct in cands:
                ok, hw_chunk = _fits(ct)
                if ok and C // ct >= 2:
                    fused_c, fused_chunk = ct, hw_chunk
                    break
            if fused_c is None:
                for ct in cands:
                    ok, hw_chunk = _fits(ct)
                    if ok:
                        fused_c, fused_chunk = ct, hw_chunk
                        break

        if fused_c is not None:
            ct = fused_c
            n_cb = C // ct
            n_chunks = HWp // fused_chunk
            kernel = functools.partial(
                _fused_train_kernel, inv_m=1.0 / m, pad_count=pad_count,
                eps=float(eps), hw_chunk=fused_chunk, n_chunks=n_chunks)
            x_spec = pl.BlockSpec((B, ct, HWp), lambda c: (0, c, 0))
            col_spec = pl.BlockSpec((ct, 1), lambda c: (c, 0))

            y3p, mean2, var2 = pl.pallas_call(
                kernel,
                grid=(n_cb,),
                in_specs=[x_spec, col_spec, col_spec],
                out_specs=(x_spec, col_spec, col_spec),
                out_shape=(jax.ShapeDtypeStruct((B, C, HWp), x.dtype),
                           jax.ShapeDtypeStruct((C, 1), jnp.float32),
                           jax.ShapeDtypeStruct((C, 1), jnp.float32)),
                compiler_params=pltpu.CompilerParams(
                    dimension_semantics=("parallel",),
                    vmem_limit_bytes=budget),
            )(x3, w.reshape(C, 1), bb.reshape(C, 1))
            mean = mean2[:, 0]
            var = var2[:, 0]
            need_norm_pass = False
        else:
            # ------------------ streaming two-pass fallback ------------------
            ct, b_tile, hw_tile = _streaming_tiles(B, C, HWp, itemsize)
            n_cb, n_bb, n_hwb = C // ct, B // b_tile, HWp // hw_tile

            x_spec = _block_spec((b_tile, ct, hw_tile),
                                 lambda c, b, hw: (b, c, hw), buffers=3)
            col_spec = pl.BlockSpec((ct, 1), lambda c, b, hw: (c, 0))

            sums, sqs = pl.pallas_call(
                _stats_kernel,
                grid=(n_cb, n_bb, n_hwb),
                in_specs=[x_spec, col_spec],
                out_specs=(col_spec, col_spec),
                out_shape=(jax.ShapeDtypeStruct((C, 1), jnp.float32),
                           jax.ShapeDtypeStruct((C, 1), jnp.float32)),
                scratch_shapes=[pltpu.VMEM((ct, 1), jnp.float32),
                                pltpu.VMEM((ct, 1), jnp.float32)],
                compiler_params=pltpu.CompilerParams(
                    dimension_semantics=("parallel", "arbitrary", "arbitrary"),
                    vmem_limit_bytes=budget),
            )(x3, rm.reshape(C, 1))

            pivot = rm                                      # (C,) shift point
            sum_d = sums[:, 0] + pad_count * pivot          # undo zero padding
            sq_d = sqs[:, 0] - pad_count * pivot * pivot
            mean_sh = sum_d / m
            mean = pivot + mean_sh
            var = jnp.maximum(sq_d / m - mean_sh * mean_sh, 0.0)

        # Running-stat update.  Original module's quirk: N = B*C*H.
        n_corr = float(B * C * H)
        bessel = n_corr / (n_corr - 1.0) if n_corr > 1.0 else 1.0
        new_rm = (1.0 - momentum) * rm + momentum * mean
        new_rv = (1.0 - momentum) * rv + momentum * var * bessel
    else:
        mean, var = rm, rv
        new_rm, new_rv = rm, rv

    if need_norm_pass:
        # Fold whitening + affine into per-channel scale/shift (O(C), in XLA).
        inv_std = 1.0 / jnp.sqrt(var + eps)
        scale = w * inv_std
        shift = bb - mean * scale

        ct, b_tile, hw_tile = _streaming_tiles(B, C, HWp, itemsize)
        n_cb, n_bb, n_hwb = C // ct, B // b_tile, HWp // hw_tile

        x_spec = _block_spec((b_tile, ct, hw_tile),
                             lambda c, b, hw: (b, c, hw), buffers=3)
        out_spec = pl.BlockSpec((b_tile, ct, hw_tile),
                                lambda c, b, hw: (b, c, hw))
        col_spec = pl.BlockSpec((ct, 1), lambda c, b, hw: (c, 0))

        y3p = pl.pallas_call(
            _norm_kernel,
            grid=(n_cb, n_bb, n_hwb),
            in_specs=[x_spec, col_spec, col_spec],
            out_specs=out_spec,
            out_shape=jax.ShapeDtypeStruct((B, C, HWp), x.dtype),
            compiler_params=pltpu.CompilerParams(
                dimension_semantics=("parallel", "parallel", "parallel"),
                vmem_limit_bytes=budget),
        )(x3, scale.reshape(C, 1), shift.reshape(C, 1))

    y3 = y3p[:, :, :HW] if HWp != HW else y3p
    y = y3.reshape(B, C, H, W)
    return y, mean, var, new_rm, new_rv


# ----------------------------------------------------------------------------
# Pure-JAX reference (mirrors MyBN_f.forward)
# ----------------------------------------------------------------------------
def _reference(x, weight, bias, running_mean, running_var,
               eps=1e-5, momentum=0.1):
    B, C, H, W = x.shape
    N = B * C * H
    mean = jnp.mean(x, axis=(0, 2, 3))
    var = jnp.mean((x - mean.reshape(1, -1, 1, 1)) ** 2, axis=(0, 2, 3))
    nrm = (1 - momentum) * running_mean + momentum * mean
    nrv = (1 - momentum) * running_var + momentum * var * (N / (N - 1))
    sd = jnp.sqrt(var + eps).reshape(1, -1, 1, 1)
    wh = (x - mean.reshape(1, -1, 1, 1)) / sd
    y = wh * weight.reshape(1, -1, 1, 1) + bias.reshape(1, -1, 1, 1)
    return y, mean, var, nrm, nrv


def _reference_eval(x, weight, bias, running_mean, running_var, eps=1e-5):
    mean = running_mean.reshape(1, -1, 1, 1)
    sd = jnp.sqrt(running_var + eps).reshape(1, -1, 1, 1)
    return (x - mean) / sd * weight.reshape(1, -1, 1, 1) + bias.reshape(1, -1, 1, 1)


if __name__ == "__main__":
    key = jax.random.PRNGKey(0)
    B, C, H, W = 2, 4, 16, 16
    x = jax.random.normal(key, (B, C, H, W), dtype=jnp.float32)

    # Deterministic parameter init, matching reset_parameters():
    weight = jnp.ones((C,), jnp.float32)          # init.ones_
    bias = jnp.zeros((C,), jnp.float32)           # init.zeros_
    running_mean = jnp.zeros((C,), jnp.float32)   # reset_running_stats
    running_var = jnp.ones((C,), jnp.float32)

    refs = _reference(x, weight, bias, running_mean, running_var)

    # Training mode: fused single-HBM-pass path.
    outs = mybn_forward(x, weight, bias, running_mean, running_var,
                        eps=1e-5, momentum=0.1, is_training=True)
    outs = jax.block_until_ready(outs)
    for o, r in zip(outs, refs):
        assert jnp.allclose(o, r, atol=1e-5, rtol=1e-5), "train (fused) mismatch"

    # Training mode: forced streaming two-pass fallback (exercises stats kernel).
    outs2 = mybn_forward(x, weight, bias, running_mean, running_var,
                         eps=1e-5, momentum=0.1, is_training=True,
                         force_two_pass=True)
    outs2 = jax.block_until_ready(outs2)
    for o, r in zip(outs2, refs):
        assert jnp.allclose(o, r, atol=1e-5, rtol=1e-5), "train (two-pass) mismatch"

    # Training mode with HW not a multiple of 128 (exercises the lane-padding
    # path and its analytic correction of the statistics).
    Hs, Ws = 10, 10
    x_small = jax.random.normal(jax.random.PRNGKey(1), (B, C, Hs, Ws),
                                dtype=jnp.float32)
    outs3 = mybn_forward(x_small, weight, bias, running_mean, running_var,
                         eps=1e-5, momentum=0.1, is_training=True)
    outs3 = jax.block_until_ready(outs3)
    refs3 = _reference(x_small, weight, bias, running_mean, running_var)
    for o, r in zip(outs3, refs3):
        assert jnp.allclose(o, r, atol=1e-5, rtol=1e-5), "train (padded HW) mismatch"

    # Eval mode (running stats only; single normalize pass).
    y_eval, *_ = mybn_forward(x, weight, bias, running_mean, running_var,
                              eps=1e-5, momentum=0.1, is_training=False)
    y_eval = jax.block_until_ready(y_eval)
    y_eval_ref = _reference_eval(x, weight, bias, running_mean, running_var)
    assert jnp.allclose(y_eval, y_eval_ref, atol=1e-5, rtol=1e-5), "eval mismatch"

    print("KERNEL_OK")
</pallas_src>

<mosaic_0001>
module attributes {stable_mosaic.version = 11 : i64} {
  func.func @_fused_train_kernel(%arg0: i32, %arg1: memref<2x4x256xf32, #tpu.memory_space<vmem>>, %arg2: memref<4x1xf32, #tpu.memory_space<vmem>>, %arg3: memref<4x1xf32, #tpu.memory_space<vmem>>, %arg4: memref<2x4x256xf32, #tpu.memory_space<vmem>>, %arg5: memref<4x1xf32, #tpu.memory_space<vmem>>, %arg6: memref<4x1xf32, #tpu.memory_space<vmem>>) attributes {dimension_semantics = [#tpu.dimension_semantics<parallel>], iteration_bounds = array<i64: 1>, scalar_prefetch = 0 : i64, scratch_operands = 0 : i64, tpu.core_type = #tpu.core_type<tc>, window_params = [{transform_indices = @transform_0, window_bounds = array<i64: 2, 4, 256>}, {transform_indices = @transform_1, window_bounds = array<i64: 4, 1>}, {transform_indices = @transform_2, window_bounds = array<i64: 4, 1>}, {transform_indices = @transform_3, window_bounds = array<i64: 2, 4, 256>}, {transform_indices = @transform_4, window_bounds = array<i64: 4, 1>}, {transform_indices = @transform_5, window_bounds = array<i64: 4, 1>}]} {
    %cst = arith.constant 0.000000e+00 : f32
    %0 = vector.broadcast %cst : f32 to vector<4x1xf32>
    %c0 = arith.constant 0 : index
    %c0_0 = arith.constant 0 : index
    %1 = vector.load %arg5[%c0, %c0_0] : memref<4x1xf32, #tpu.memory_space<vmem>>, vector<4x1xf32>
    tpu.vector_store %arg5[%c0, %c0_0], %0 {strides = array<i32>} : memref<4x1xf32, #tpu.memory_space<vmem>>, vector<4x1xf32>,
    %c0_i32 = arith.constant 0 : i32
    %c256_i32 = arith.constant 256 : i32
    %2 = arith.muli %c0_i32, %c256_i32 : i32
    %3 = tpu.assume_multiple %2, 128 : i32
    %c0_1 = arith.constant 0 : index
    %c0_2 = arith.constant 0 : index
    %4 = arith.index_cast %3 : i32 to index
    %5 = vector.load %arg1[%c0_1, %c0_2, %4] : memref<2x4x256xf32, #tpu.memory_space<vmem>>, vector<2x4x256xf32>
    %c0_3 = arith.constant 0 : index
    %c0_4 = arith.constant 0 : index
    %6 = vector.load %arg5[%c0_3, %c0_4] : memref<4x1xf32, #tpu.memory_space<vmem>>, vector<4x1xf32>
    %cst_5 = arith.constant dense<0.000000e+00> : vector<4x256xf32>
    %7 = vector.multi_reduction <add>, %5, %cst_5 [0] : vector<2x4x256xf32> to vector<4x256xf32>
    %cst_6 = arith.constant dense<0.000000e+00> : vector<4xf32>
    %8 = vector.multi_reduction <add>, %7, %cst_6 [1] : vector<4x256xf32> to vector<4xf32>
    %9 = vector.shape_cast %8 : vector<4xf32> to vector<4x1xf32>
    %10 = arith.addf %6, %9 : vector<4x1xf32>
    %c0_7 = arith.constant 0 : index
    %c0_8 = arith.constant 0 : index
    %11 = vector.load %arg5[%c0_7, %c0_8] : memref<4x1xf32, #tpu.memory_space<vmem>>, vector<4x1xf32>
    tpu.vector_store %arg5[%c0_7, %c0_8], %10 {strides = array<i32>} : memref<4x1xf32, #tpu.memory_space<vmem>>, vector<4x1xf32>,
    %c1_i32 = arith.constant 1 : i32
    %c0_9 = arith.constant 0 : index
    %c0_10 = arith.constant 0 : index
    %12 = vector.load %arg5[%c0_9, %c0_10] : memref<4x1xf32, #tpu.memory_space<vmem>>, vector<4x1xf32>
    %cst_11 = arith.constant 0.001953125 : f32
    %13 = vector.broadcast %cst_11 : f32 to vector<4x1xf32>
    %14 = arith.mulf %12, %13 : vector<4x1xf32>
    %c0_12 = arith.constant 0 : index
    %c0_13 = arith.constant 0 : index
    %15 = vector.load %arg5[%c0_12, %c0_13] : memref<4x1xf32, #tpu.memory_space<vmem>>, vector<4x1xf32>
    tpu.vector_store %arg5[%c0_12, %c0_13], %14 {strides = array<i32>} : memref<4x1xf32, #tpu.memory_space<vmem>>, vector<4x1xf32>,
    %c0_14 = arith.constant 0 : index
    %c0_15 = arith.constant 0 : index
    %16 = vector.load %arg5[%c0_14, %c0_15] : memref<4x1xf32, #tpu.memory_space<vmem>>, vector<4x1xf32>
    %cst_16 = arith.constant 0.000000e+00 : f32
    %17 = vector.broadcast %cst_16 : f32 to vector<4x1xf32>
    %c0_17 = arith.constant 0 : index
    %c0_18 = arith.constant 0 : index
    %18 = vector.load %arg6[%c0_17, %c0_18] : memref<4x1xf32, #tpu.memory_space<vmem>>, vector<4x1xf32>
    tpu.vector_store %arg6[%c0_17, %c0_18], %17 {strides = array<i32>} : memref<4x1xf32, #tpu.memory_space<vmem>>, vector<4x1xf32>,
    %c0_i32_19 = arith.constant 0 : i32
    %c256_i32_20 = arith.constant 256 : i32
    %19 = arith.muli %c0_i32_19, %c256_i32_20 : i32
    %20 = tpu.assume_multiple %19, 128 : i32
    %c0_21 = arith.constant 0 : index
    %c0_22 = arith.constant 0 : index
    %21 = arith.index_cast %20 : i32 to index
    %22 = vector.load %arg1[%c0_21, %c0_22, %21] : memref<2x4x256xf32, #tpu.memory_space<vmem>>, vector<2x4x256xf32>
    %23 = vector.shape_cast %16 : vector<4x1xf32> to vector<1x4x1xf32>
    %24 = vector.broadcast %23 : vector<1x4x1xf32> to vector<2x4x256xf32>
    %25 = arith.subf %22, %24 : vector<2x4x256xf32>
    %c0_23 = arith.constant 0 : index
    %c0_24 = arith.constant 0 : index
    %26 = vector.load %arg6[%c0_23, %c0_24] : memref<4x1xf32, #tpu.memory_space<vmem>>, vector<4x1xf32>
    %27 = arith.mulf %25, %25 : vector<2x4x256xf32>
    %cst_25 = arith.constant dense<0.000000e+00> : vector<4x256xf32>
    %28 = vector.multi_reduction <add>, %27, %cst_25 [0] : vector<2x4x256xf32> to vector<4x256xf32>
    %cst_26 = arith.constant dense<0.000000e+00> : vector<4xf32>
    %29 = vector.multi_reduction <add>, %28, %cst_26 [1] : vector<4x256xf32> to vector<4xf32>
    %30 = vector.shape_cast %29 : vector<4xf32> to vector<4x1xf32>
    %31 = arith.addf %26, %30 : vector<4x1xf32>
    %c0_27 = arith.constant 0 : index
    %c0_28 = arith.constant 0 : index
    %32 = vector.load %arg6[%c0_27, %c0_28] : memref<4x1xf32, #tpu.memory_space<vmem>>, vector<4x1xf32>
    tpu.vector_store %arg6[%c0_27, %c0_28], %31 {strides = array<i32>} : memref<4x1xf32, #tpu.memory_space<vmem>>, vector<4x1xf32>,
    %c1_i32_29 = arith.constant 1 : i32
    %c0_30 = arith.constant 0 : index
    %c0_31 = arith.constant 0 : index
    %33 = vector.load %arg6[%c0_30, %c0_31] : memref<4x1xf32, #tpu.memory_space<vmem>>, vector<4x1xf32>
    %cst_32 = arith.constant 0.000000e+00 : f32
    %34 = vector.broadcast %cst_32 : f32 to vector<4x1xf32>
    %35 = arith.mulf %34, %16 : vector<4x1xf32>
    %36 = arith.mulf %35, %16 : vector<4x1xf32>
    %37 = arith.subf %33, %36 : vector<4x1xf32>
    %cst_33 = arith.constant 0.001953125 : f32
    %38 = vector.broadcast %cst_33 : f32 to vector<4x1xf32>
    %39 = arith.mulf %37, %38 : vector<4x1xf32>
    %cst_34 = arith.constant 0.000000e+00 : f32
    %40 = vector.broadcast %cst_34 : f32 to vector<4x1xf32>
    %41 = arith.maximumf %39, %40 : vector<4x1xf32>
    %c0_35 = arith.constant 0 : index
    %c0_36 = arith.constant 0 : index
    %42 = vector.load %arg6[%c0_35, %c0_36] : memref<4x1xf32, #tpu.memory_space<vmem>>, vector<4x1xf32>
    tpu.vector_store %arg6[%c0_35, %c0_36], %41 {strides = array<i32>} : memref<4x1xf32, #tpu.memory_space<vmem>>, vector<4x1xf32>,
    %c0_37 = arith.constant 0 : index
    %c0_38 = arith.constant 0 : index
    %43 = vector.load %arg2[%c0_37, %c0_38] : memref<4x1xf32, #tpu.memory_space<vmem>>, vector<4x1xf32>
    %cst_39 = arith.constant 9.99999974E-6 : f32
    %44 = vector.broadcast %cst_39 : f32 to vector<4x1xf32>
    %45 = arith.addf %41, %44 : vector<4x1xf32>
    %46 = math.sqrt %45 : vector<4x1xf32>
    %47 = arith.divf %43, %46 : vector<4x1xf32>
    %c0_40 = arith.constant 0 : index
    %c0_41 = arith.constant 0 : index
    %48 = vector.load %arg3[%c0_40, %c0_41] : memref<4x1xf32, #tpu.memory_space<vmem>>, vector<4x1xf32>
    %49 = arith.mulf %16, %47 : vector<4x1xf32>
    %50 = arith.subf %48, %49 : vector<4x1xf32>
    %c0_i32_42 = arith.constant 0 : i32
    %c256_i32_43 = arith.constant 256 : i32
    %51 = arith.muli %c0_i32_42, %c256_i32_43 : i32
    %52 = tpu.assume_multiple %51, 128 : i32
    %c0_44 = arith.constant 0 : index
    %c0_45 = arith.constant 0 : index
    %53 = arith.index_cast %52 : i32 to index
    %54 = vector.load %arg1[%c0_44, %c0_45, %53] : memref<2x4x256xf32, #tpu.memory_space<vmem>>, vector<2x4x256xf32>
    %55 = vector.shape_cast %47 : vector<4x1xf32> to vector<1x4x1xf32>
    %56 = vector.broadcast %55 : vector<1x4x1xf32> to vector<2x4x256xf32>
    %57 = arith.mulf %54, %56 : vector<2x4x256xf32>
    %58 = vector.shape_cast %50 : vector<4x1xf32> to vector<1x4x1xf32>
    %59 = vector.broadcast %58 : vector<1x4x1xf32> to vector<2x4x256xf32>
    %60 = arith.addf %57, %59 : vector<2x4x256xf32>
    %c0_46 = arith.constant 0 : index
    %c0_47 = arith.constant 0 : index
    %61 = arith.index_cast %52 : i32 to index
    %62 = vector.load %arg4[%c0_46, %c0_47, %61] : memref<2x4x256xf32, #tpu.memory_space<vmem>>, vector<2x4x256xf32>
    tpu.vector_store %arg4[%c0_46, %c0_47, %61], %60 {strides = array<i32>} : memref<2x4x256xf32, #tpu.memory_space<vmem>>, vector<2x4x256xf32>,
    %c1_i32_48 = arith.constant 1 : i32
    return
  }
  func.func @transform_0(%arg0: i32) -> (i32, i32, i32) {
    %c0_i32 = arith.constant 0 : i32
    %c0_i32_0 = arith.constant 0 : i32
    %c0_i32_1 = arith.constant 0 : i32
    return %c0_i32, %arg0, %c0_i32_0 : i32, i32, i32
  }
  func.func @transform_1(%arg0: i32) -> (i32, i32) {
    %c0_i32 = arith.constant 0 : i32
    %c0_i32_0 = arith.constant 0 : i32
    return %arg0, %c0_i32 : i32, i32
  }
  func.func @transform_2(%arg0: i32) -> (i32, i32) {
    %c0_i32 = arith.constant 0 : i32
    %c0_i32_0 = arith.constant 0 : i32
    return %arg0, %c0_i32 : i32, i32
  }
  func.func @transform_3(%arg0: i32) -> (i32, i32, i32) {
    %c0_i32 = arith.constant 0 : i32
    %c0_i32_0 = arith.constant 0 : i32
    %c0_i32_1 = arith.constant 0 : i32
    return %c0_i32, %arg0, %c0_i32_0 : i32, i32, i32
  }
  func.func @transform_4(%arg0: i32) -> (i32, i32) {
    %c0_i32 = arith.constant 0 : i32
    %c0_i32_0 = arith.constant 0 : i32
    return %arg0, %c0_i32 : i32, i32
  }
  func.func @transform_5(%arg0: i32) -> (i32, i32) {
    %c0_i32 = arith.constant 0 : i32
    %c0_i32_0 = arith.constant 0 : i32
    return %arg0, %c0_i32 : i32, i32
  }
}

</mosaic_0001>

<bundles_post_ra>
// kernel: tpu_custom_call.1
= control target key start
LH: loop header
LB: loop body
LE: loop exit
PB: predicated region body
PF: predicated region fallthrough
CT: control target
= control target key end

     0   :  { %11 = vsyncpa [#allocation3], 0  ;;  %s379_s0 = inlined_call_operand.hbm [shape: f32[2,4,256], index: 0, kind: input, shape index: {}]   ;;  %s380_s1 = inlined_call_operand.vmem [shape: f32[4,1], index: 1, kind: input, shape index: {}]   ;;  %s381_s2 = inlined_call_operand.vmem [shape: f32[4,1], index: 2, kind: input, shape index: {}]   ;;  %s382_s3 = inlined_call_operand.hbm [shape: f32[2,4,256], index: 3, kind: output, shape index: {0}]   ;;  %s383_s4 = inlined_call_operand.vmem [shape: f32[4,1], index: 4, kind: output, shape index: {1}]   ;;  %s384_s5 = inlined_call_operand.vmem [shape: f32[4,1], index: 5, kind: output, shape index: {2}]  }
   0x1   :  { %12 = vsyncpa [#allocation4], 0  ;;  %s241_s18 = smov [#allocation2]   ;;  %s193_s22 = scalar_lea.hbm %s379_s0, 256 }
   0x2   :  { %s18_s19 = sshll.u32 %s241_s18, 4  ;;  %p194_p0 = scmp.ne.s32.totalorder %s379_s0, %s193_s22  ;;  %s19_s19 = int_to_ptr.vmem [resolvable:$true] %s18_s19 }
   0x3   :  { %p197_p1 = scmp.lt.u32.totalorder %s193_s22, %s379_s0 }
   0x5   :  { %p199_p2 = pnand %p197_p1, %p194_p0 }
   0x7   :  { %202 = shalt.err (!%p199_p2)
}
   0x8   :  { %s203_s27 = scalar_lea.vmem %s19_s19, 256  ;;  %p208_p4 = scmp.lt.s32.totalorder %s19_s19, %s19_s19 }
   0x9   :  { %p204_p3 = scmp.ne.s32.totalorder %s19_s19, %s203_s27  ;;  %p209_p5 = scmp.lt.s32.totalorder %s203_s27, %s203_s27 }
   0xb   :  { %p210_p6 = por %p209_p5, %p208_p4 }
   0xd   :  { %p211_p7 = pnand %p210_p6, %p204_p3 }
   0xf   :  { %214 = shalt.err (!%p211_p7)
}
  0x10   :  { %s242_s28 = smov 128   ;;  %s243_s29 = smov 8  }
  0x11   :  { %24 = dma.hbm_to_vmem [thread:$0]  %s379_s0, 256, %s19_s19, [#allocation3], %s242_s28, %s242_s28, %s243_s29  }
  0x12   :  { %237 = dma.done.wait [#allocation3], 256  }
  0x13   :  { %238 = vsyncadd [#allocation3], 4294967040  ;;  %vm32_vm0 = vcmask 3072   ;;  %v244_v0 = vmov 0.0   ;;  %vm43_vm1 = vcmask 1043456   ;;  %v301_v1 = vld [vmem:[#allocation2] sm:$0xff]  ;;  %v71_v23 = vlaneseq }
  0x14   :  { %33 = vst.msk [vmem:[%s383_s4] sm:$0xf] %vm32_vm0, %v244_v0  ;;  %61 = vst.msk [vmem:[%s384_s5] sm:$0xf] %vm32_vm0, %v244_v0  ;;  %v303_v2 = vld [vmem:[#allocation2 + $0x8] sm:$0xff]  ;;  %v39_v3 = vcombine.high %v301_v1, %v301_v1  ;;  %v44_v5 = vsel %vm43_vm1, %v301_v1, 0.0 }
  0x15   :  { %v40_v4 = vcombine.high %v303_v2, %v303_v2  ;;  %v45_v6 = vsel %vm43_vm1, %v303_v2, 0.0  ;;  %v245_v14 = vmov 0   ;;  %v246_v21 = vmov 839922192   ;;  %v107_v59 = vld [vmem:[%s380_s1] sm:$0xf] }
  0x16   :  { %v46_v7 = vadd.f32 %v45_v6, %v44_v5  ;;  %v47_v8 = vsel %vm43_vm1, %v39_v3, 0.0  ;;  %185 = vset.pattern.permute.xlu0 %v245_v14  ;;  %186 = vset.pattern.permute.xlu1 %v245_v14  ;;  %v69_v22 = vunpack.c.l.s4 %v246_v21  ;;  %v72_v25 = vshrl.u32 %v71_v23, 7  ;;  %v118_v62 = vld [vmem:[%s381_s2] sm:$0xf] }
  0x17   :  { %v48_v9 = vsel %vm43_vm1, %v40_v4, 0.0 }
  0x18   :  { %v49_v10 = vadd.f32 %v48_v9, %v47_v8  ;;  %v50_v11 = vsel %vm43_vm1, %v46_v7, 0.0  ;;  %v70_v24 = vunpack.c.0.s8 %v69_v22 }
  0x1a   :  { %v51_v12 = vsel %vm43_vm1, %v49_v10, 0.0  ;;  %v73_v26 = vsub.s32 %v70_v24, %v72_v25 }
  0x1b   :  { %v52_v13 = vadd.f32 %v51_v12, %v50_v11  ;;  %v36_v15 = vld [vmem:[%s383_s4] sm:$0xf] }
  0x1c   :  { %v78_v44 = vld [vmem:[%s384_s5] sm:$0xf] }
  0x1d   :  { %53 = vadd.xlane.f32.xlu0 %v52_v13 }
  0xaa   :  { %v54_v16 = vpop.xlane.xlu0 %53 }
  0xab   :  { %v55_v17 = vadd.f32 %v54_v16, %v36_v15 }
  0xad   :  { %56 = vst.msk [vmem:[%s383_s4] sm:$0xf] %vm32_vm0, %v55_v17 }
  0xb4   :  { %v57_v18 = vld [vmem:[%s383_s4] sm:$0xf] }
  0xb5   :  { %v58_v19 = vmul.f32 0.001953125, %v57_v18 }
  0xb7   :  { %59 = vst.msk [vmem:[%s383_s4] sm:$0xf] %vm32_vm0, %v58_v19 }
  0xbe   :  { %v60_v20 = vld [vmem:[%s383_s4] sm:$0xf] }
  0xbf   :  { %66 = vperm.xlu0 %185, %v60_v20   ;;  %v101_v47 = vmul.f32 0.0, %v60_v20 }
  0xc1   :  { %v102_v48 = vmul.f32 %v101_v47, %v60_v20 }
 0x13e   :  { %v67_v27 = vpop.permute.xlu0 %66 }
 0x13f   :  { %v74_v28 = vrot.slane %v67_v27, %v73_v26 }
 0x141   :  { %v76_v29 = vsub.f32 %v301_v1, %v74_v28  ;;  %v77_v30 = vsub.f32 %v303_v2, %v74_v28 }
 0x143   :  { %v79_v31 = vmul.f32 %v76_v29, %v76_v29  ;;  %v80_v32 = vmul.f32 %v77_v30, %v77_v30 }
 0x145   :  { %v83_v33 = vcombine.high %v79_v31, %v79_v31  ;;  %v84_v34 = vcombine.high %v80_v32, %v80_v32  ;;  %v87_v35 = vsel %vm43_vm1, %v79_v31, 0.0  ;;  %v88_v36 = vsel %vm43_vm1, %v80_v32, 0.0 }
 0x146   :  { %v89_v37 = vadd.f32 %v88_v36, %v87_v35 }
 0x147   :  { %v90_v38 = vsel %vm43_vm1, %v83_v33, 0.0  ;;  %v91_v39 = vsel %vm43_vm1, %v84_v34, 0.0 }
 0x148   :  { %v92_v40 = vadd.f32 %v91_v39, %v90_v38  ;;  %v93_v41 = vsel %vm43_vm1, %v89_v37, 0.0 }
 0x14a   :  { %v94_v42 = vsel %vm43_vm1, %v92_v40, 0.0 }
 0x14b   :  { %v95_v43 = vadd.f32 %v94_v42, %v93_v41 }
 0x14d   :  { %96 = vadd.xlane.f32.xlu1 %v95_v43 }
 0x1da   :  { %v97_v45 = vpop.xlane.xlu1 %96 }
 0x1db   :  { %v98_v46 = vadd.f32 %v97_v45, %v78_v44 }
 0x1dd   :  { %99 = vst.msk [vmem:[%s384_s5] sm:$0xf] %vm32_vm0, %v98_v46 }
 0x1e4   :  { %v100_v49 = vld [vmem:[%s384_s5] sm:$0xf] }
 0x1e5   :  { %v103_v50 = vsub.f32 %v100_v49, %v102_v48 }
 0x1e7   :  { %v104_v51 = vmul.f32 0.001953125, %v103_v50 }
 0x1e9   :  { %v105_v52 = vmax.f32 %v104_v51, 0.0 }
 0x1eb   :  { %106 = vst.msk [vmem:[%s384_s5] sm:$0xf] %vm32_vm0, %v105_v52  ;;  %v108_v53 = vadd.f32 1e-05, %v105_v52  ;;  %s247_s5 = smov [#allocation5]  }
 0x1ec   :  { %s158_s8 = sshll.u32 %s247_s5, 4  ;;  %s159_s8 = int_to_ptr.vmem [resolvable:$true] %s158_s8 }
 0x1ed   :  { %189 = vrsqrt.f32 %v108_v53  ;;  %vm111_vm2 = vcmp.eq.f32.partialorder %v108_v53, inf  ;;  %v114_v56 = vand.u32 2147483648, %v108_v53  ;;  %vm113_vm3 = vcmp.eq.f32.partialorder %v108_v53, 0.0  ;;  %s215_s1 = scalar_lea.vmem %s159_s8, 256  ;;  %p220_p9 = scmp.lt.s32.totalorder %s159_s8, %s159_s8 }
 0x1ee   :  { %p216_p8 = scmp.ne.s32.totalorder %s159_s8, %s215_s1  ;;  %p221_p10 = scmp.lt.s32.totalorder %s215_s1, %s215_s1 }
 0x1f0   :  { %p222_p11 = por %p221_p10, %p220_p9 }
 0x1f2   :  { %p223_p12 = pnand %p222_p11, %p216_p8 }
 0x1f7   :  { %v190_v54 = vpop.eup %189 }
 0x1f8   :  { %v110_v55 = vmul.f32 %v190_v54, %v108_v53 }
 0x1fa   :  { %v112_v57 = vsel %vm111_vm2, %v108_v53, %v110_v55 }
 0x1fb   :  { %v115_v58 = vsel %vm113_vm3, %v114_v56, %v112_v57 }
 0x1fc   :  { %191 = vrcp.f32 %v115_v58 }
 0x206   :  { %v192_v60 = vpop.eup %191 }
 0x207   :  { %v117_v61 = vmul.f32 %v192_v60, %v107_v59 }
 0x209   :  { %125 = vperm.xlu1 %186, %v117_v61   ;;  %v119_v63 = vmul.f32 %v117_v61, %v60_v20 }
 0x20b   :  { %v120_v0 = vsub.f32 %v118_v62, %v119_v63 }
 0x20d   :  { %139 = vperm.xlu1 %186, %v120_v0  }
 0x288   :  { %v126_v3 = vpop.permute.xlu1 %125 }
 0x289   :  { %v133_v4 = vrot.slane %v126_v3, %v73_v26 }
 0x28b   :  { %v135_v6 = vmul.f32 %v133_v4, %v301_v1  ;;  %v136_v7 = vmul.f32 %v133_v4, %v303_v2 }
 0x28c   :  { %v140_v5 = vpop.permute.xlu1 %139 }
 0x28d   :  { %v147_v8 = vrot.slane %v140_v5, %v73_v26 }
 0x28f   :  { %v149_v9 = vadd.f32 %v147_v8, %v135_v6  ;;  %v150_v10 = vadd.f32 %v147_v8, %v136_v7 }
 0x291   :  { %151 = vst [vmem:[#allocation5] sm:$0xff] %v149_v9  ;;  %152 = vst [vmem:[#allocation5 + $0x8] sm:$0xff] %v150_v10 }
 0x292   :  { %226 = shalt.err (!%p223_p12)
}
 0x293   :  { %s227_s10 = scalar_lea.hbm %s382_s3, 256 }
 0x294   :  { %p228_p13 = scmp.ne.s32.totalorder %s382_s3, %s227_s10  ;;  %p231_p0 = scmp.lt.u32.totalorder %s227_s10, %s382_s3 }
 0x296   :  { %p233_p1 = pnand %p231_p0, %p228_p13 }
 0x298   :  { %236 = shalt.err (!%p233_p1)
}
 0x299   :  { %164 = dma.vmem_to_hbm [thread:$0]  %s159_s8, 256, %s382_s3, [#allocation4], %s242_s28, %s242_s28, %s243_s29  }
 0x29a   :  { %239 = dma.done.wait [#allocation4], 256  }
 0x29b   :  { %240 = vsyncadd [#allocation4], 4294967040 }
 0x29c   :  { %176 = vsyncpa [#allocation3], 1 }
 0x29d   :  { %177 = vsyncpa [#allocation4], 1 }

</bundles_post_ra>
